<compile_context>
chip_gen: v6e
topology: v6e:2x2x1
jax: 0.10.0
libtpu: 0.0.40
codegen_flags: <defaults>
</compile_context>

<pallas_src>
import functools

import jax
import jax.numpy as jnp
import numpy as np
from jax import lax
from jax.experimental import pallas as pl
from jax.experimental.pallas import tpu as pltpu


# ----------------------------------------------------------------------------
# Shared pooling step: one HW tile of masked sum-pooling, accumulated in f32
# ----------------------------------------------------------------------------
def _accumulate_pool(fq_ref, fk_ref, posm_ref, selm_ref, pq_ref, pk_ref, cnt_ref):
    posm = posm_ref[...]                        # (Nt, HWt) f32 0/1
    selm = selm_ref[...]                        # (Nt, HWt) f32 0/1
    w = (posm * selm).astype(fq_ref.dtype)      # exact 0/1 in the feature dtype
    # 'nch,nh->nc': feature tile is the LHS (M = C rows through the MXU),
    # contraction on the LHS minor (HW) dim -> no transpose of the big tile.
    dn = (((2,), (1,)), ((0,), (0,)))
    pq_ref[...] += lax.dot_general(fq_ref[...], w, dn,
                                   preferred_element_type=jnp.float32)
    pk_ref[...] += lax.dot_general(fk_ref[...], w, dn,
                                   preferred_element_type=jnp.float32)
    # per-slice positive-voxel counts (exact in f32 for HW < 2^24)
    cnt_ref[...] += jnp.sum(selm, axis=-1, keepdims=True)


# ----------------------------------------------------------------------------
# Epilogue math on the pooled (N, C) sums -> one lane-dense (1, 128) stats row
# ----------------------------------------------------------------------------
def _epilogue_compute(pooled_q, pooled_k, counts, *, tau, n_valid, n_pad):
    # pooled_q/k: (n_pad, C) f32 masked SUMS; counts: (n_pad, 1) f32.
    # approx reciprocal is exact-enough: the per-row scalar cancels in the L2
    # normalization, and it preserves the zero/nonzero semantics of the pad
    # check.  max(counts, 1) only guards degenerate all-empty slices.
    inv_counts = pl.reciprocal(jnp.maximum(counts, 1.0), approx=True)
    mq = pooled_q * inv_counts                   # mean-pooled q (n_pad, C)
    mk = pooled_k * inv_counts                   # mean-pooled k (n_pad, C)

    # pad mask: bool of channel 0 of the averaged k features (0 for padded rows)
    padf = (mk[:, 0:1] != 0.0).astype(jnp.float32)                   # (n_pad, 1)

    # F.normalize(p=2, dim=-1), eps=1e-12 (max(||x||, eps) == sqrt(max(s, eps^2)))
    eps2 = jnp.float32(1e-24)
    qn = mq * lax.rsqrt(jnp.maximum(jnp.sum(mq * mq, -1, keepdims=True), eps2))
    kn = mk * lax.rsqrt(jnp.maximum(jnp.sum(mk * mk, -1, keepdims=True), eps2))

    # sim[i, j] = <kn_i, qn_j>  (== norm_features_k @ norm_features_q^T)
    sim = lax.dot_general(kn, qn, (((1,), (1,)), ((), ())),
                          preferred_element_type=jnp.float32)         # (n_pad, n_pad)

    ridx = lax.broadcasted_iota(jnp.int32, (n_pad, n_pad), 0)
    cidx = lax.broadcasted_iota(jnp.int32, (n_pad, n_pad), 1)
    col_valid = cidx < n_valid
    validf = jnp.where((ridx < n_valid) & col_valid, 1.0, 0.0)
    diagf = jnp.where((ridx == cidx) & (ridx < n_valid), 1.0, 0.0)
    neg_big = jnp.float32(-1e30)

    # cross entropy with label == row index, averaged over rows with pad=True
    logits = jnp.where(col_valid, sim * jnp.float32(1.0 / tau), neg_big)
    row_max = jnp.max(logits, axis=-1, keepdims=True)
    lse = jnp.log(jnp.sum(jnp.exp(logits - row_max), axis=-1,
                          keepdims=True)) + row_max                   # (n_pad, 1)
    diag_logit = jnp.sum(logits * diagf, axis=-1, keepdims=True)      # (n_pad, 1)
    ce = lse - diag_logit
    loss = (jnp.sum(ce * padf, axis=0, keepdims=True)
            / jnp.sum(padf, axis=0, keepdims=True))                   # (1, 1)

    # pos / neg cosine similarity statistics (over the real N rows/cols only)
    nf = jnp.float32(n_valid)
    diag_sum = jnp.sum(sim * diagf, axis=(0, 1), keepdims=True)
    tot_sum = jnp.sum(sim * validf, axis=(0, 1), keepdims=True)
    pos_cos = diag_sum / nf
    if n_valid > 1:
        neg_cos = (tot_sum - diag_sum) / (nf * (nf - 1.0))
    else:
        neg_cos = jnp.zeros((1, 1), jnp.float32)

    # softmax statistics (softmax over the real columns only)
    s_max = jnp.max(jnp.where(col_valid, sim, neg_big), axis=-1, keepdims=True)
    e = jnp.where(col_valid, jnp.exp(sim - s_max), 0.0)
    sm = e / jnp.sum(e, axis=-1, keepdims=True)
    diag_sum_s = jnp.sum(sm * diagf, axis=(0, 1), keepdims=True)
    tot_sum_s = jnp.sum(sm * validf, axis=(0, 1), keepdims=True)
    pos_sm = diag_sum_s / nf
    if n_valid > 1:
        neg_sm = (tot_sum_s - diag_sum_s) / (nf * (nf - 1.0))
    else:
        neg_sm = jnp.zeros((1, 1), jnp.float32)

    # pack the 5 scalars into one lane-dense (1, 128) row (single unmasked vst)
    lane = lax.broadcasted_iota(jnp.int32, (1, 128), 1)

    def put(slot, val):  # val is (1, 1)
        return jnp.where(lane == slot, val, jnp.float32(0.0))

    return (put(0, loss) + put(1, pos_cos) + put(2, neg_cos)
            + put(3, pos_sm) + put(4, neg_sm))


# ----------------------------------------------------------------------------
# Fused kernel (common small-N case): pooling over HW grid + epilogue at last
# ----------------------------------------------------------------------------
def _fused_kernel(fq_ref, fk_ref, posm_ref, selm_ref, out_ref,
                  pq_ref, pk_ref, cnt_ref, *, tau, n_valid, n_pad):
    j = pl.program_id(0)

    @pl.when(j == 0)
    def _init():
        pq_ref[...] = jnp.zeros_like(pq_ref)
        pk_ref[...] = jnp.zeros_like(pk_ref)
        cnt_ref[...] = jnp.zeros_like(cnt_ref)

    _accumulate_pool(fq_ref, fk_ref, posm_ref, selm_ref, pq_ref, pk_ref, cnt_ref)

    @pl.when(j == pl.num_programs(0) - 1)
    def _finalize():
        out_ref[...] = _epilogue_compute(pq_ref[...], pk_ref[...], cnt_ref[...],
                                         tau=tau, n_valid=n_valid, n_pad=n_pad)


# ----------------------------------------------------------------------------
# Two-stage path (large N): pooling kernel + tiny epilogue kernel
# ----------------------------------------------------------------------------
def _pool_kernel(fq_ref, fk_ref, posm_ref, selm_ref, pq_ref, pk_ref, cnt_ref):
    @pl.when(pl.program_id(1) == 0)
    def _init():
        pq_ref[...] = jnp.zeros_like(pq_ref)
        pk_ref[...] = jnp.zeros_like(pk_ref)
        cnt_ref[...] = jnp.zeros_like(cnt_ref)

    _accumulate_pool(fq_ref, fk_ref, posm_ref, selm_ref, pq_ref, pk_ref, cnt_ref)


def _epilogue_kernel(pq_ref, pk_ref, cnt_ref, out_ref, *, tau, n_valid, n_pad):
    out_ref[...] = _epilogue_compute(pq_ref[...], pk_ref[...], cnt_ref[...],
                                     tau=tau, n_valid=n_valid, n_pad=n_pad)


# ----------------------------------------------------------------------------
# Wrapper
# ----------------------------------------------------------------------------
def contrastive_learning_loss(features_q, features_k, mask, *, tau,
                              force_two_stage=False):
    """features_q/k: (max_num, B, C, H, W); mask: (B, max_num, H, W) bool."""
    M, B, C, H, W = features_q.shape
    assert features_k.shape == (M, B, C, H, W)
    assert mask.shape == (B, M, H, W)
    N = M * B
    HW = H * W
    assert HW < (1 << 24), "f32 per-slice voxel counts must stay exact"

    # --- layout prep: metadata-only reshapes for features, tiny f32 masks ----
    fq = features_q.reshape(N, C, HW)
    fk = features_k.reshape(N, C, HW)
    posm = jnp.transpose(mask, (1, 0, 2, 3)).reshape(N, HW).astype(jnp.float32)
    selm = mask.reshape(N, HW).astype(jnp.float32)
    itemsize = np.dtype(fq.dtype).itemsize

    # --- generation-aware VMEM budget for double-buffered feature tiles ------
    try:
        cap = int(pltpu.get_tpu_info().vmem_capacity_bytes)
    except Exception:
        cap = 128 * 1024 * 1024
    if cap <= 64 * 1024 * 1024:            # v7x: 64 MiB physical per TC
        feat_budget = 16 * 1024 * 1024
        vmem_limit = 32 * 1024 * 1024
    else:                                  # v5e / v6e: 128 MiB physical
        feat_budget = 24 * 1024 * 1024
        vmem_limit = 64 * 1024 * 1024

    def feat_bytes(n_rows, t):             # q + k feature tiles, double-buffered
        return 2 * 2 * n_rows * C * t * itemsize

    def largest_dividing_tile(n_rows):
        best = None
        if HW % 128 == 0:
            for t in range(128, HW + 1, 128):
                if HW % t == 0 and feat_bytes(n_rows, t) <= feat_budget:
                    best = t
        if best is None and feat_bytes(n_rows, HW) <= feat_budget:
            best = HW                       # full-HW block (no 128 divisibility needed)
        return best

    # -------------------------------------------------------------------------
    # Fused single-call path: whole-N feature blocks, epilogue on last HW step.
    # TODO(synk): on v7x (2 TCs) a 2-way parallel split of the HW reduction
    # (partial pooled copies summed in the epilogue) would engage both cores
    # when n_grid == 1; not implemented here.
    # -------------------------------------------------------------------------
    fused_hw_tile = largest_dividing_tile(N) if N <= 64 else None
    if fused_hw_tile is not None and not force_two_stage:
        hw_tile = fused_hw_tile
        hw_grid = -(-HW // hw_tile)
        out_row = pl.pallas_call(
            functools.partial(_fused_kernel, tau=float(tau), n_valid=N, n_pad=N),
            grid=(hw_grid,),
            in_specs=[
                pl.BlockSpec((N, C, hw_tile), lambda j: (0, 0, j)),
                pl.BlockSpec((N, C, hw_tile), lambda j: (0, 0, j)),
                pl.BlockSpec((N, hw_tile), lambda j: (0, j)),
                pl.BlockSpec((N, hw_tile), lambda j: (0, j)),
            ],
            out_specs=pl.BlockSpec((1, 128), lambda j: (0, 0)),
            out_shape=jax.ShapeDtypeStruct((1, 128), jnp.float32),
            scratch_shapes=[
                pltpu.VMEM((N, C), jnp.float32),   # pooled_q accumulator
                pltpu.VMEM((N, C), jnp.float32),   # pooled_k accumulator
                pltpu.VMEM((N, 1), jnp.float32),   # voxel counts
            ],
            compiler_params=pltpu.CompilerParams(
                dimension_semantics=("arbitrary",),
                vmem_limit_bytes=vmem_limit),
        )(fq, fk, posm, selm)
    else:
        # ----------------- two-stage path (large N) ---------------------------
        n_tile = 8
        N_pad = pl.cdiv(N, n_tile) * n_tile
        hw_tile = largest_dividing_tile(n_tile)
        HW_use = HW
        if hw_tile is None:
            # Rare fallback: HW has no usable 128-multiple divisor and a whole-HW
            # block exceeds the budget -> pad HW up to a 128-multiple tile.
            hw_tile = 128
            while hw_tile * 2 <= HW and feat_bytes(n_tile, hw_tile * 2) <= feat_budget:
                hw_tile *= 2
            HW_use = pl.cdiv(HW, hw_tile) * hw_tile
        if N_pad != N or HW_use != HW:
            # TODO(synk): this padding is a full HBM copy of the features; only
            # hit when N % 8 != 0 with N > 64, or HW lacks a 128-multiple divisor.
            fq = jnp.pad(fq, ((0, N_pad - N), (0, 0), (0, HW_use - HW)))
            fk = jnp.pad(fk, ((0, N_pad - N), (0, 0), (0, HW_use - HW)))
            posm = jnp.pad(posm, ((0, N_pad - N), (0, HW_use - HW)))
            selm = jnp.pad(selm, ((0, N_pad - N), (0, HW_use - HW)))
        n_grid = N_pad // n_tile
        hw_grid = HW_use // hw_tile

        pooled_q, pooled_k, counts = pl.pallas_call(
            _pool_kernel,
            grid=(n_grid, hw_grid),
            in_specs=[
                pl.BlockSpec((n_tile, C, hw_tile), lambda i, j: (i, 0, j)),
                pl.BlockSpec((n_tile, C, hw_tile), lambda i, j: (i, 0, j)),
                pl.BlockSpec((n_tile, hw_tile), lambda i, j: (i, j)),
                pl.BlockSpec((n_tile, hw_tile), lambda i, j: (i, j)),
            ],
            out_specs=(
                pl.BlockSpec((n_tile, C), lambda i, j: (i, 0)),
                pl.BlockSpec((n_tile, C), lambda i, j: (i, 0)),
                pl.BlockSpec((n_tile, 1), lambda i, j: (i, 0)),
            ),
            out_shape=(
                jax.ShapeDtypeStruct((N_pad, C), jnp.float32),
                jax.ShapeDtypeStruct((N_pad, C), jnp.float32),
                jax.ShapeDtypeStruct((N_pad, 1), jnp.float32),
            ),
            compiler_params=pltpu.CompilerParams(
                dimension_semantics=("parallel", "arbitrary"),
                vmem_limit_bytes=vmem_limit),
        )(fq, fk, posm, selm)

        out_row = pl.pallas_call(
            functools.partial(_epilogue_kernel, tau=float(tau),
                              n_valid=N, n_pad=N_pad),
            out_shape=jax.ShapeDtypeStruct((1, 128), jnp.float32),
            in_specs=[pl.BlockSpec(memory_space=pltpu.MemorySpace.VMEM)] * 3,
            out_specs=pl.BlockSpec(memory_space=pltpu.MemorySpace.VMEM),
        )(pooled_q, pooled_k, counts)

    loss = out_row[0, 0]
    loss_dict = {'loss': loss,
                 'pos_cos_sim': out_row[0, 1],
                 'neg_cos_sim': out_row[0, 2],
                 'pos_softmax_sim': out_row[0, 3],
                 'neg_softmax_sim': out_row[0, 4]}
    return loss, loss_dict


# ----------------------------------------------------------------------------
# Pure-JAX reference (mirror of the PyTorch forward under the same constraints)
# ----------------------------------------------------------------------------
def _reference(features_q, features_k, mask, tau):
    M, B, C, H, W = features_q.shape
    N = M * B
    pos_mask = jnp.transpose(mask, (1, 0, 2, 3))[:, :, None, :, :].astype(jnp.float32)
    mq = (features_q.astype(jnp.float32) * pos_mask).reshape(N, C, H * W)
    mk = (features_k.astype(jnp.float32) * pos_mask).reshape(N, C, H * W)
    selm = mask.astype(jnp.float32).reshape(N, H * W)
    counts = selm.sum(-1, keepdims=True)
    pooled_q = (mq * selm[:, None, :]).sum(-1) / counts
    pooled_k = (mk * selm[:, None, :]).sum(-1) / counts
    padf = (pooled_k[:, 0] != 0).astype(jnp.float32)

    def l2n(x):
        return x / jnp.maximum(jnp.sqrt((x * x).sum(-1, keepdims=True)), 1e-12)

    qn, kn = l2n(pooled_q), l2n(pooled_k)
    sim = kn @ qn.T
    logits = sim / tau
    lse = jax.scipy.special.logsumexp(logits, axis=-1)
    ce = lse - jnp.diagonal(logits)
    loss = (ce * padf).sum() / padf.sum()
    dsum, tsum = jnp.trace(sim), sim.sum()
    pos_cos = dsum / N
    neg_cos = (tsum - dsum) / (N * (N - 1)) if N > 1 else jnp.float32(0)
    sm = jax.nn.softmax(sim, axis=-1)
    dsum_s, tsum_s = jnp.trace(sm), sm.sum()
    pos_sm = dsum_s / N
    neg_sm = (tsum_s - dsum_s) / (N * (N - 1)) if N > 1 else jnp.float32(0)
    return loss, {'loss': loss, 'pos_cos_sim': pos_cos, 'neg_cos_sim': neg_cos,
                  'pos_softmax_sim': pos_sm, 'neg_softmax_sim': neg_sm}


if __name__ == "__main__":
    key = jax.random.PRNGKey(0)
    B, M, C, H, W = 2, 4, 16, 16, 16      # batch, max_num agents, channels, spatial
    tau = 0.1
    # max_voxel = H*W, so every positive voxel is averaged (randperm is a no-op)
    # TODO(synk): torch.randperm sub-sampling when positives > max_voxel is
    # RNG dependent and not reproduced; inputs are constrained so it never fires.

    k1, k2, k3 = jax.random.split(key, 3)
    features_q = jax.random.normal(k1, (M, B, C, H, W), jnp.float32)
    features_k = jax.random.normal(k2, (M, B, C, H, W), jnp.float32)
    mask = jax.random.bernoulli(k3, 0.25, (B, M, H, W))
    # guarantee >= 1 positive per (b, n) slice so no slice is skipped
    mask = mask.at[:, :, 0, 0].set(True)

    ref_loss, ref_stats = _reference(features_q, features_k, mask, tau)

    # fused single-call path
    loss, stats = contrastive_learning_loss(features_q, features_k, mask, tau=tau)
    jax.block_until_ready(loss)
    assert np.isfinite(float(loss))
    np.testing.assert_allclose(float(loss), float(ref_loss), rtol=2e-3, atol=2e-3)
    for name in stats:
        np.testing.assert_allclose(float(stats[name]), float(ref_stats[name]),
                                   rtol=2e-3, atol=2e-3)

    # two-stage path (exercised explicitly for coverage)
    loss2, stats2 = contrastive_learning_loss(features_q, features_k, mask,
                                              tau=tau, force_two_stage=True)
    jax.block_until_ready(loss2)
    np.testing.assert_allclose(float(loss2), float(ref_loss), rtol=2e-3, atol=2e-3)
    for name in stats2:
        np.testing.assert_allclose(float(stats2[name]), float(ref_stats[name]),
                                   rtol=2e-3, atol=2e-3)

    print("KERNEL_OK")
</pallas_src>

<mosaic_0001>
module attributes {stable_mosaic.version = 11 : i64} {
  func.func @_fused_kernel(%arg0: i32, %arg1: memref<8x16x256xf32, #tpu.memory_space<vmem>>, %arg2: memref<8x16x256xf32, #tpu.memory_space<vmem>>, %arg3: memref<8x256xf32, #tpu.memory_space<vmem>>, %arg4: memref<8x256xf32, #tpu.memory_space<vmem>>, %arg5: memref<1x128xf32, #tpu.memory_space<vmem>>, %arg6: memref<8x16xf32, #tpu.memory_space<vmem>>, %arg7: memref<8x16xf32, #tpu.memory_space<vmem>>, %arg8: memref<8x1xf32, #tpu.memory_space<vmem>>) attributes {dimension_semantics = [#tpu.dimension_semantics<arbitrary>], iteration_bounds = array<i64: 1>, scalar_prefetch = 0 : i64, scratch_operands = 3 : i64, tpu.core_type = #tpu.core_type<tc>, window_params = [{transform_indices = @transform_0, window_bounds = array<i64: 8, 16, 256>}, {transform_indices = @transform_1, window_bounds = array<i64: 8, 16, 256>}, {transform_indices = @transform_2, window_bounds = array<i64: 8, 256>}, {transform_indices = @transform_3, window_bounds = array<i64: 8, 256>}, {pipeline_mode = #tpu.pipeline_mode<synchronous>, transform_indices = @transform_4, window_bounds = array<i64: 1, 128>}]} {
    %c0_i32 = arith.constant 0 : i32
    %0 = arith.cmpi eq, %arg0, %c0_i32 : i32
    %1 = arith.extui %0 : i1 to i32
    %c0_i32_0 = arith.constant 0 : i32
    %2 = arith.cmpi ne, %1, %c0_i32_0 : i32
    scf.if %2 {
      %cst_26 = arith.constant 0.000000e+00 : f32
      %24 = vector.broadcast %cst_26 : f32 to vector<8x16xf32>
      %c0_27 = arith.constant 0 : index
      %c0_28 = arith.constant 0 : index
      %25 = vector.load %arg6[%c0_27, %c0_28] : memref<8x16xf32, #tpu.memory_space<vmem>>, vector<8x16xf32>
      tpu.vector_store %arg6[%c0_27, %c0_28], %24 {strides = array<i32>} : memref<8x16xf32, #tpu.memory_space<vmem>>, vector<8x16xf32>,
      %cst_29 = arith.constant 0.000000e+00 : f32
      %26 = vector.broadcast %cst_29 : f32 to vector<8x16xf32>
      %c0_30 = arith.constant 0 : index
      %c0_31 = arith.constant 0 : index
      %27 = vector.load %arg7[%c0_30, %c0_31] : memref<8x16xf32, #tpu.memory_space<vmem>>, vector<8x16xf32>
      tpu.vector_store %arg7[%c0_30, %c0_31], %26 {strides = array<i32>} : memref<8x16xf32, #tpu.memory_space<vmem>>, vector<8x16xf32>,
      %cst_32 = arith.constant 0.000000e+00 : f32
      %28 = vector.broadcast %cst_32 : f32 to vector<8x1xf32>
      %c0_33 = arith.constant 0 : index
      %c0_34 = arith.constant 0 : index
      %29 = vector.load %arg8[%c0_33, %c0_34] : memref<8x1xf32, #tpu.memory_space<vmem>>, vector<8x1xf32>
      tpu.vector_store %arg8[%c0_33, %c0_34], %28 {strides = array<i32>} : memref<8x1xf32, #tpu.memory_space<vmem>>, vector<8x1xf32>,
    } else {
    }
    %c0 = arith.constant 0 : index
    %c0_1 = arith.constant 0 : index
    %3 = vector.load %arg3[%c0, %c0_1] : memref<8x256xf32, #tpu.memory_space<vmem>>, vector<8x256xf32>
    %c0_2 = arith.constant 0 : index
    %c0_3 = arith.constant 0 : index
    %4 = vector.load %arg4[%c0_2, %c0_3] : memref<8x256xf32, #tpu.memory_space<vmem>>, vector<8x256xf32>
    %5 = arith.mulf %3, %4 : vector<8x256xf32>
    %c0_4 = arith.constant 0 : index
    %c0_5 = arith.constant 0 : index
    %6 = vector.load %arg6[%c0_4, %c0_5] : memref<8x16xf32, #tpu.memory_space<vmem>>, vector<8x16xf32>
    %c0_6 = arith.constant 0 : index
    %c0_7 = arith.constant 0 : index
    %c0_8 = arith.constant 0 : index
    %7 = vector.load %arg1[%c0_6, %c0_7, %c0_8] : memref<8x16x256xf32, #tpu.memory_space<vmem>>, vector<8x16x256xf32>
    %cst = arith.constant dense<0.000000e+00> : vector<8x16xf32>
    %8 = tpu.matmul %7, %5, %cst {dimension_numbers = #tpu.dot_dimension_numbers<[2], [1], [1], [], [0, 0, 0, 1], [0], [0]>} : vector<8x16x256xf32>, vector<8x256xf32>, vector<8x16xf32> -> vector<8x16xf32>
    %9 = arith.addf %6, %8 : vector<8x16xf32>
    %c0_9 = arith.constant 0 : index
    %c0_10 = arith.constant 0 : index
    %10 = vector.load %arg6[%c0_9, %c0_10] : memref<8x16xf32, #tpu.memory_space<vmem>>, vector<8x16xf32>
    tpu.vector_store %arg6[%c0_9, %c0_10], %9 {strides = array<i32>} : memref<8x16xf32, #tpu.memory_space<vmem>>, vector<8x16xf32>,
    %c0_11 = arith.constant 0 : index
    %c0_12 = arith.constant 0 : index
    %11 = vector.load %arg7[%c0_11, %c0_12] : memref<8x16xf32, #tpu.memory_space<vmem>>, vector<8x16xf32>
    %c0_13 = arith.constant 0 : index
    %c0_14 = arith.constant 0 : index
    %c0_15 = arith.constant 0 : index
    %12 = vector.load %arg2[%c0_13, %c0_14, %c0_15] : memref<8x16x256xf32, #tpu.memory_space<vmem>>, vector<8x16x256xf32>
    %cst_16 = arith.constant dense<0.000000e+00> : vector<8x16xf32>
    %13 = tpu.matmul %12, %5, %cst_16 {dimension_numbers = #tpu.dot_dimension_numbers<[2], [1], [1], [], [0, 0, 0, 1], [0], [0]>} : vector<8x16x256xf32>, vector<8x256xf32>, vector<8x16xf32> -> vector<8x16xf32>
    %14 = arith.addf %11, %13 : vector<8x16xf32>
    %c0_17 = arith.constant 0 : index
    %c0_18 = arith.constant 0 : index
    %15 = vector.load %arg7[%c0_17, %c0_18] : memref<8x16xf32, #tpu.memory_space<vmem>>, vector<8x16xf32>
    tpu.vector_store %arg7[%c0_17, %c0_18], %14 {strides = array<i32>} : memref<8x16xf32, #tpu.memory_space<vmem>>, vector<8x16xf32>,
    %c0_19 = arith.constant 0 : index
    %c0_20 = arith.constant 0 : index
    %16 = vector.load %arg8[%c0_19, %c0_20] : memref<8x1xf32, #tpu.memory_space<vmem>>, vector<8x1xf32>
    %cst_21 = arith.constant dense<0.000000e+00> : vector<8xf32>
    %17 = vector.multi_reduction <add>, %4, %cst_21 [1] : vector<8x256xf32> to vector<8xf32>
    %18 = vector.shape_cast %17 : vector<8xf32> to vector<8x1xf32>
    %19 = arith.addf %16, %18 : vector<8x1xf32>
    %c0_22 = arith.constant 0 : index
    %c0_23 = arith.constant 0 : index
    %20 = vector.load %arg8[%c0_22, %c0_23] : memref<8x1xf32, #tpu.memory_space<vmem>>, vector<8x1xf32>
    tpu.vector_store %arg8[%c0_22, %c0_23], %19 {strides = array<i32>} : memref<8x1xf32, #tpu.memory_space<vmem>>, vector<8x1xf32>,
    %c0_i32_24 = arith.constant 0 : i32
    %21 = arith.cmpi eq, %arg0, %c0_i32_24 : i32
    %22 = arith.extui %21 : i1 to i32
    %c0_i32_25 = arith.constant 0 : i32
    %23 = arith.cmpi ne, %22, %c0_i32_25 : i32
    scf.if %23 {
      %c0_26 = arith.constant 0 : index
      %c0_27 = arith.constant 0 : index
      %24 = vector.load %arg6[%c0_26, %c0_27] : memref<8x16xf32, #tpu.memory_space<vmem>>, vector<8x16xf32>
      %c0_28 = arith.constant 0 : index
      %c0_29 = arith.constant 0 : index
      %25 = vector.load %arg7[%c0_28, %c0_29] : memref<8x16xf32, #tpu.memory_space<vmem>>, vector<8x16xf32>
      %c0_30 = arith.constant 0 : index
      %c0_31 = arith.constant 0 : index
      %26 = vector.load %arg8[%c0_30, %c0_31] : memref<8x1xf32, #tpu.memory_space<vmem>>, vector<8x1xf32>
      %cst_32 = arith.constant 1.000000e+00 : f32
      %27 = vector.broadcast %cst_32 : f32 to vector<8x1xf32>
      %28 = arith.maximumf %26, %27 : vector<8x1xf32>
      %29 = tpu.reciprocal %28 {approx = true} : vector<8x1xf32> -> vector<8x1xf32>
      %30 = vector.broadcast %29 : vector<8x1xf32> to vector<8x16xf32>
      %31 = arith.mulf %24, %30 : vector<8x16xf32>
      %32 = vector.broadcast %29 : vector<8x1xf32> to vector<8x16xf32>
      %33 = arith.mulf %25, %32 : vector<8x16xf32>
      %34 = vector.extract_strided_slice %33 {offsets = [0, 0], sizes = [8, 1], strides = [1, 1]} : vector<8x16xf32> to vector<8x1xf32>
      %cst_33 = arith.constant 0.000000e+00 : f32
      %35 = vector.broadcast %cst_33 : f32 to vector<8x1xf32>
      %36 = arith.cmpf one, %34, %35 : vector<8x1xf32>
      %37 = arith.extui %36 : vector<8x1xi1> to vector<8x1xi32>
      %38 = arith.sitofp %37 : vector<8x1xi32> to vector<8x1xf32>
      %39 = arith.mulf %31, %31 : vector<8x16xf32>
      %cst_34 = arith.constant dense<0.000000e+00> : vector<8xf32>
      %40 = vector.multi_reduction <add>, %39, %cst_34 [1] : vector<8x16xf32> to vector<8xf32>
      %41 = vector.shape_cast %40 : vector<8xf32> to vector<8x1xf32>
      %cst_35 = arith.constant 1.000000e-24 : f32
      %42 = vector.broadcast %cst_35 : f32 to vector<8x1xf32>
      %43 = arith.maximumf %41, %42 : vector<8x1xf32>
      %44 = math.rsqrt %43 : vector<8x1xf32>
      %45 = vector.broadcast %44 : vector<8x1xf32> to vector<8x16xf32>
      %46 = arith.mulf %31, %45 : vector<8x16xf32>
      %47 = arith.mulf %33, %33 : vector<8x16xf32>
      %cst_36 = arith.constant dense<0.000000e+00> : vector<8xf32>
      %48 = vector.multi_reduction <add>, %47, %cst_36 [1] : vector<8x16xf32> to vector<8xf32>
      %49 = vector.shape_cast %48 : vector<8xf32> to vector<8x1xf32>
      %cst_37 = arith.constant 1.000000e-24 : f32
      %50 = vector.broadcast %cst_37 : f32 to vector<8x1xf32>
      %51 = arith.maximumf %49, %50 : vector<8x1xf32>
      %52 = math.rsqrt %51 : vector<8x1xf32>
      %53 = vector.broadcast %52 : vector<8x1xf32> to vector<8x16xf32>
      %54 = arith.mulf %33, %53 : vector<8x16xf32>
      %cst_38 = arith.constant dense<0.000000e+00> : vector<8x8xf32>
      %55 = tpu.matmul %54, %46, %cst_38 {dimension_numbers = #tpu.dot_dimension_numbers<[1], [1], [0], [0], [0, 0, 1, 0], [], []>} : vector<8x16xf32>, vector<8x16xf32>, vector<8x8xf32> -> vector<8x8xf32>
      %56 = tpu.iota {dimensions = array<i32: 0>} : vector<8x8xi32>
      %57 = tpu.iota {dimensions = array<i32: 1>} : vector<8x8xi32>
      %c8_i32 = arith.constant 8 : i32
      %58 = vector.broadcast %c8_i32 : i32 to vector<8x8xi32>
      %59 = arith.cmpi slt, %57, %58 : vector<8x8xi32>
      %c8_i32_39 = arith.constant 8 : i32
      %60 = vector.broadcast %c8_i32_39 : i32 to vector<8x8xi32>
      %61 = arith.cmpi slt, %56, %60 : vector<8x8xi32>
      %62 = arith.andi %61, %59 : vector<8x8xi1>
      %cst_40 = arith.constant 1.000000e+00 : f32
      %cst_41 = arith.constant 0.000000e+00 : f32
      %63 = vector.broadcast %cst_40 : f32 to vector<8x8xf32>
      %64 = vector.broadcast %cst_41 : f32 to vector<8x8xf32>
      %65 = arith.select %62, %63, %64 : vector<8x8xi1>, vector<8x8xf32>
      %66 = arith.cmpi eq, %56, %57 : vector<8x8xi32>
      %c8_i32_42 = arith.constant 8 : i32
      %67 = vector.broadcast %c8_i32_42 : i32 to vector<8x8xi32>
      %68 = arith.cmpi slt, %56, %67 : vector<8x8xi32>
      %69 = arith.andi %66, %68 : vector<8x8xi1>
      %cst_43 = arith.constant 1.000000e+00 : f32
      %cst_44 = arith.constant 0.000000e+00 : f32
      %70 = vector.broadcast %cst_43 : f32 to vector<8x8xf32>
      %71 = vector.broadcast %cst_44 : f32 to vector<8x8xf32>
      %72 = arith.select %69, %70, %71 : vector<8x8xi1>, vector<8x8xf32>
      %cst_45 = arith.constant 1.000000e+01 : f32
      %73 = vector.broadcast %cst_45 : f32 to vector<8x8xf32>
      %74 = arith.mulf %55, %73 : vector<8x8xf32>
      %cst_46 = arith.constant -1.000000e+30 : f32
      %75 = vector.broadcast %cst_46 : f32 to vector<8x8xf32>
      %76 = arith.select %59, %74, %75 : vector<8x8xi1>, vector<8x8xf32>
      %cst_47 = arith.constant dense<0xFF800000> : vector<8xf32>
      %77 = vector.multi_reduction <maximumf>, %76, %cst_47 [1] : vector<8x8xf32> to vector<8xf32>
      %78 = vector.shape_cast %77 : vector<8xf32> to vector<8x1xf32>
      %79 = vector.broadcast %78 : vector<8x1xf32> to vector<8x8xf32>
      %80 = arith.subf %76, %79 : vector<8x8xf32>
      %81 = math.exp %80 : vector<8x8xf32>
      %cst_48 = arith.constant dense<0.000000e+00> : vector<8xf32>
      %82 = vector.multi_reduction <add>, %81, %cst_48 [1] : vector<8x8xf32> to vector<8xf32>
      %83 = vector.shape_cast %82 : vector<8xf32> to vector<8x1xf32>
      %84 = math.log %83 : vector<8x1xf32>
      %85 = arith.addf %84, %78 : vector<8x1xf32>
      %86 = arith.mulf %76, %72 : vector<8x8xf32>
      %cst_49 = arith.constant dense<0.000000e+00> : vector<8xf32>
      %87 = vector.multi_reduction <add>, %86, %cst_49 [1] : vector<8x8xf32> to vector<8xf32>
      %88 = vector.shape_cast %87 : vector<8xf32> to vector<8x1xf32>
      %89 = arith.subf %85, %88 : vector<8x1xf32>
      %90 = arith.mulf %89, %38 : vector<8x1xf32>
      %cst_50 = arith.constant dense<0.000000e+00> : vector<1xf32>
      %91 = vector.multi_reduction <add>, %90, %cst_50 [0] : vector<8x1xf32> to vector<1xf32>
      %92 = vector.shape_cast %91 : vector<1xf32> to vector<1x1xf32>
      %cst_51 = arith.constant dense<0.000000e+00> : vector<1xf32>
      %93 = vector.multi_reduction <add>, %38, %cst_51 [0] : vector<8x1xf32> to vector<1xf32>
      %94 = vector.shape_cast %93 : vector<1xf32> to vector<1x1xf32>
      %95 = arith.divf %92, %94 : vector<1x1xf32>
      %96 = arith.mulf %55, %72 : vector<8x8xf32>
      %97 = vector.shape_cast %96 : vector<8x8xf32> to vector<1x8x8xf32>
      %cst_52 = arith.constant dense<0.000000e+00> : vector<1xf32>
      %98 = vector.multi_reduction <add>, %97, %cst_52 [1, 2] : vector<1x8x8xf32> to vector<1xf32>
      %99 = vector.shape_cast %98 : vector<1xf32> to vector<1x1x1xf32>
      %100 = vector.extract %99[0, 0, 0] : f32 from vector<1x1x1xf32>
      %101 = vector.broadcast %100 : f32 to vector<1x1xf32>
      %102 = arith.mulf %55, %65 : vector<8x8xf32>
      %103 = vector.shape_cast %102 : vector<8x8xf32> to vector<1x8x8xf32>
      %cst_53 = arith.constant dense<0.000000e+00> : vector<1xf32>
      %104 = vector.multi_reduction <add>, %103, %cst_53 [1, 2] : vector<1x8x8xf32> to vector<1xf32>
      %105 = vector.shape_cast %104 : vector<1xf32> to vector<1x1x1xf32>
      %106 = vector.extract %105[0, 0, 0] : f32 from vector<1x1x1xf32>
      %107 = vector.broadcast %106 : f32 to vector<1x1xf32>
      %cst_54 = arith.constant 8.000000e+00 : f32
      %108 = vector.broadcast %cst_54 : f32 to vector<1x1xf32>
      %109 = arith.divf %101, %108 : vector<1x1xf32>
      %110 = arith.subf %107, %101 : vector<1x1xf32>
      %cst_55 = arith.constant 8.000000e+00 : f32
      %cst_56 = arith.constant 1.000000e+00 : f32
      %111 = arith.subf %cst_55, %cst_56 : f32
      %cst_57 = arith.constant 8.000000e+00 : f32
      %112 = arith.mulf %cst_57, %111 : f32
      %113 = vector.broadcast %112 : f32 to vector<1x1xf32>
      %114 = arith.divf %110, %113 : vector<1x1xf32>
      %cst_58 = arith.constant -1.000000e+30 : f32
      %115 = vector.broadcast %cst_58 : f32 to vector<8x8xf32>
      %116 = arith.select %59, %55, %115 : vector<8x8xi1>, vector<8x8xf32>
      %cst_59 = arith.constant dense<0xFF800000> : vector<8xf32>
      %117 = vector.multi_reduction <maximumf>, %116, %cst_59 [1] : vector<8x8xf32> to vector<8xf32>
      %118 = vector.shape_cast %117 : vector<8xf32> to vector<8x1xf32>
      %119 = vector.broadcast %118 : vector<8x1xf32> to vector<8x8xf32>
      %120 = arith.subf %55, %119 : vector<8x8xf32>
      %121 = math.exp %120 : vector<8x8xf32>
      %cst_60 = arith.constant 0.000000e+00 : f32
      %122 = vector.broadcast %cst_60 : f32 to vector<8x8xf32>
      %123 = arith.select %59, %121, %122 : vector<8x8xi1>, vector<8x8xf32>
      %cst_61 = arith.constant dense<0.000000e+00> : vector<8xf32>
      %124 = vector.multi_reduction <add>, %123, %cst_61 [1] : vector<8x8xf32> to vector<8xf32>
      %125 = vector.shape_cast %124 : vector<8xf32> to vector<8x1xf32>
      %126 = vector.broadcast %125 : vector<8x1xf32> to vector<8x8xf32>
      %127 = arith.divf %123, %126 : vector<8x8xf32>
      %128 = arith.mulf %127, %72 : vector<8x8xf32>
      %129 = vector.shape_cast %128 : vector<8x8xf32> to vector<1x8x8xf32>
      %cst_62 = arith.constant dense<0.000000e+00> : vector<1xf32>
      %130 = vector.multi_reduction <add>, %129, %cst_62 [1, 2] : vector<1x8x8xf32> to vector<1xf32>
      %131 = vector.shape_cast %130 : vector<1xf32> to vector<1x1x1xf32>
      %132 = vector.extract %131[0, 0, 0] : f32 from vector<1x1x1xf32>
      %133 = vector.broadcast %132 : f32 to vector<1x1xf32>
      %134 = arith.mulf %127, %65 : vector<8x8xf32>
      %135 = vector.shape_cast %134 : vector<8x8xf32> to vector<1x8x8xf32>
      %cst_63 = arith.constant dense<0.000000e+00> : vector<1xf32>
      %136 = vector.multi_reduction <add>, %135, %cst_63 [1, 2] : vector<1x8x8xf32> to vector<1xf32>
      %137 = vector.shape_cast %136 : vector<1xf32> to vector<1x1x1xf32>
      %138 = vector.extract %137[0, 0, 0] : f32 from vector<1x1x1xf32>
      %139 = vector.broadcast %138 : f32 to vector<1x1xf32>
      %cst_64 = arith.constant 8.000000e+00 : f32
      %140 = vector.broadcast %cst_64 : f32 to vector<1x1xf32>
      %141 = arith.divf %133, %140 : vector<1x1xf32>
      %142 = arith.subf %139, %133 : vector<1x1xf32>
      %cst_65 = arith.constant 8.000000e+00 : f32
      %cst_66 = arith.constant 1.000000e+00 : f32
      %143 = arith.subf %cst_65, %cst_66 : f32
      %cst_67 = arith.constant 8.000000e+00 : f32
      %144 = arith.mulf %cst_67, %143 : f32
      %145 = vector.broadcast %144 : f32 to vector<1x1xf32>
      %146 = arith.divf %142, %145 : vector<1x1xf32>
      %147 = tpu.iota {dimensions = array<i32: 1>} : vector<1x128xi32>
      %c0_i32_68 = arith.constant 0 : i32
      %148 = vector.broadcast %c0_i32_68 : i32 to vector<1x128xi32>
      %149 = arith.cmpi eq, %147, %148 : vector<1x128xi32>
      %cst_69 = arith.constant 0.000000e+00 : f32
      %150 = vector.shape_cast %95 : vector<1x1xf32> to vector<1x1xf32>
      %151 = vector.broadcast %150 : vector<1x1xf32> to vector<1x128xf32>
      %152 = vector.broadcast %cst_69 : f32 to vector<1x128xf32>
      %153 = arith.select %149, %151, %152 : vector<1x128xi1>, vector<1x128xf32>
      %c1_i32 = arith.constant 1 : i32
      %154 = vector.broadcast %c1_i32 : i32 to vector<1x128xi32>
      %155 = arith.cmpi eq, %147, %154 : vector<1x128xi32>
      %cst_70 = arith.constant 0.000000e+00 : f32
      %156 = vector.shape_cast %109 : vector<1x1xf32> to vector<1x1xf32>
      %157 = vector.broadcast %156 : vector<1x1xf32> to vector<1x128xf32>
      %158 = vector.broadcast %cst_70 : f32 to vector<1x128xf32>
      %159 = arith.select %155, %157, %158 : vector<1x128xi1>, vector<1x128xf32>
      %160 = arith.addf %153, %159 : vector<1x128xf32>
      %c2_i32 = arith.constant 2 : i32
      %161 = vector.broadcast %c2_i32 : i32 to vector<1x128xi32>
      %162 = arith.cmpi eq, %147, %161 : vector<1x128xi32>
      %cst_71 = arith.constant 0.000000e+00 : f32
      %163 = vector.shape_cast %114 : vector<1x1xf32> to vector<1x1xf32>
      %164 = vector.broadcast %163 : vector<1x1xf32> to vector<1x128xf32>
      %165 = vector.broadcast %cst_71 : f32 to vector<1x128xf32>
      %166 = arith.select %162, %164, %165 : vector<1x128xi1>, vector<1x128xf32>
      %167 = arith.addf %160, %166 : vector<1x128xf32>
      %c3_i32 = arith.constant 3 : i32
      %168 = vector.broadcast %c3_i32 : i32 to vector<1x128xi32>
      %169 = arith.cmpi eq, %147, %168 : vector<1x128xi32>
      %cst_72 = arith.constant 0.000000e+00 : f32
      %170 = vector.shape_cast %141 : vector<1x1xf32> to vector<1x1xf32>
      %171 = vector.broadcast %170 : vector<1x1xf32> to vector<1x128xf32>
      %172 = vector.broadcast %cst_72 : f32 to vector<1x128xf32>
      %173 = arith.select %169, %171, %172 : vector<1x128xi1>, vector<1x128xf32>
      %174 = arith.addf %167, %173 : vector<1x128xf32>
      %c4_i32 = arith.constant 4 : i32
      %175 = vector.broadcast %c4_i32 : i32 to vector<1x128xi32>
      %176 = arith.cmpi eq, %147, %175 : vector<1x128xi32>
      %cst_73 = arith.constant 0.000000e+00 : f32
      %177 = vector.shape_cast %146 : vector<1x1xf32> to vector<1x1xf32>
      %178 = vector.broadcast %177 : vector<1x1xf32> to vector<1x128xf32>
      %179 = vector.broadcast %cst_73 : f32 to vector<1x128xf32>
      %180 = arith.select %176, %178, %179 : vector<1x128xi1>, vector<1x128xf32>
      %181 = arith.addf %174, %180 : vector<1x128xf32>
      %c0_74 = arith.constant 0 : index
      %c0_75 = arith.constant 0 : index
      %182 = vector.load %arg5[%c0_74, %c0_75] : memref<1x128xf32, #tpu.memory_space<vmem>>, vector<1x128xf32>
      tpu.vector_store %arg5[%c0_74, %c0_75], %181 {strides = array<i32>} : memref<1x128xf32, #tpu.memory_space<vmem>>, vector<1x128xf32>,
    } else {
    }
    return
  }
  func.func @transform_0(%arg0: i32) -> (i32, i32, i32) {
    %c0_i32 = arith.constant 0 : i32
    %c0_i32_0 = arith.constant 0 : i32
    %c0_i32_1 = arith.constant 0 : i32
    return %c0_i32, %c0_i32_0, %arg0 : i32, i32, i32
  }
  func.func @transform_1(%arg0: i32) -> (i32, i32, i32) {
    %c0_i32 = arith.constant 0 : i32
    %c0_i32_0 = arith.constant 0 : i32
    %c0_i32_1 = arith.constant 0 : i32
    return %c0_i32, %c0_i32_0, %arg0 : i32, i32, i32
  }
  func.func @transform_2(%arg0: i32) -> (i32, i32) {
    %c0_i32 = arith.constant 0 : i32
    %c0_i32_0 = arith.constant 0 : i32
    return %c0_i32, %arg0 : i32, i32
  }
  func.func @transform_3(%arg0: i32) -> (i32, i32) {
    %c0_i32 = arith.constant 0 : i32
    %c0_i32_0 = arith.constant 0 : i32
    return %c0_i32, %arg0 : i32, i32
  }
  func.func @transform_4(%arg0: i32) -> (i32, i32) {
    %c0_i32 = arith.constant 0 : i32
    %c0_i32_0 = arith.constant 0 : i32
    %c0_i32_1 = arith.constant 0 : i32
    return %c0_i32, %c0_i32_0 : i32, i32
  }
}

</mosaic_0001>

<bundles_post_ra>
// kernel: tpu_custom_call.1
= control target key start
LH: loop header
LB: loop body
LE: loop exit
PB: predicated region body
PF: predicated region fallthrough
CT: control target
= control target key end

     0   :  { %9 = vsyncpa [#allocation6], 0  ;;  %s1306_s0 = inlined_call_operand.hbm [shape: f32[8,16,256], index: 0, kind: input, shape index: {}]   ;;  %s1307_s1 = inlined_call_operand.hbm [shape: f32[8,16,256], index: 1, kind: input, shape index: {}]   ;;  %s1308_s2 = inlined_call_operand.hbm [shape: f32[8,256], index: 2, kind: input, shape index: {}]   ;;  %s1309_s3 = inlined_call_operand.hbm [shape: f32[8,256], index: 3, kind: input, shape index: {}]   ;;  %s1310_s4 = inlined_call_operand.hbm [shape: f32[1,128], index: 4, kind: output, shape index: {}]  }
   0x1   :  { %10 = vsyncpa [#allocation9], 0 }
   0x2   :  { %11 = vsyncpa [#allocation12], 0 }
   0x3   :  { %12 = vsyncpa [#allocation7], 0  ;;  %s1017_s15 = smov [#allocation8]   ;;  %s1018_s17 = smov [#allocation5]  }
   0x4   :  { %s30_s16 = sshll.u32 %s1017_s15, 4  ;;  %s18_s18 = sshll.u32 %s1018_s17, 4  ;;  %s31_s16 = int_to_ptr.vmem [resolvable:$true] %s30_s16  ;;  %s19_s18 = int_to_ptr.vmem [resolvable:$true] %s18_s18 }
   0x5   :  { %s917_s19 = scalar_lea.vmem %s31_s16, 4096  ;;  %p922_p1 = scmp.lt.s32.totalorder %s31_s16, %s31_s16 }
   0x6   :  { %p918_p0 = scmp.ne.s32.totalorder %s31_s16, %s917_s19  ;;  %p923_p2 = scmp.lt.s32.totalorder %s917_s19, %s917_s19 }
   0x8   :  { %p924_p3 = por %p923_p2, %p922_p1 }
   0xa   :  { %p925_p4 = pnand %p924_p3, %p918_p0 }
   0xc   :  { %928 = shalt.err (!%p925_p4)
}
   0xd   :  { %s1019_s20 = smov 256   ;;  %s1020_s21 = smov 16  }
   0xe   :  { %36 = dma.hbm_to_vmem [thread:$0]  %s1307_s1, 4096, %s31_s16, [#allocation9], %s1019_s20, %s1019_s20, %s1020_s21  }
   0xf   :  { %s937_s24 = scalar_lea.vmem %s19_s18, 4096  ;;  %p942_p6 = scmp.lt.s32.totalorder %s19_s18, %s19_s18 }
  0x10   :  { %p938_p5 = scmp.ne.s32.totalorder %s19_s18, %s937_s24  ;;  %p943_p7 = scmp.lt.s32.totalorder %s937_s24, %s937_s24 }
  0x12   :  { %p944_p8 = por %p943_p7, %p942_p6 }
  0x14   :  { %p945_p9 = pnand %p944_p8, %p938_p5 }
  0x16   :  { %948 = shalt.err (!%p945_p9)
}
  0x17   :  { %24 = dma.hbm_to_vmem [thread:$0]  %s1306_s0, 4096, %s19_s18, [#allocation6], %s1019_s20, %s1019_s20, %s1020_s21  }
  0x18   :  { %s1021_s27 = smov [#allocation10]   ;;  %s1022_s29 = smov [#allocation11]  }
  0x19   :  { %s43_s28 = sshll.u32 %s1021_s27, 4  ;;  %s53_s30 = sshll.u32 %s1022_s29, 4  ;;  %s44_s28 = int_to_ptr.vmem [resolvable:$true] %s43_s28  ;;  %s54_s30 = int_to_ptr.vmem [resolvable:$true] %s53_s30 }
  0x1a   :  { %s957_s5 = scalar_lea.vmem %s44_s28, 256  ;;  %p962_p11 = scmp.lt.s32.totalorder %s44_s28, %s44_s28 }
  0x1b   :  { %p958_p10 = scmp.ne.s32.totalorder %s44_s28, %s957_s5  ;;  %p963_p12 = scmp.lt.s32.totalorder %s957_s5, %s957_s5 }
  0x1d   :  { %p964_p13 = por %p963_p12, %p962_p11 }
  0x1f   :  { %p965_p0 = pnand %p964_p13, %p958_p10 }
  0x21   :  { %968 = shalt.err (!%p965_p0)
}
  0x22   :  { %46 = dma.hbm_to_vmem [thread:$0]  %s1308_s2, 256, %s44_s28, [#allocation9]  }
  0x23   :  { %s977_s7 = scalar_lea.vmem %s54_s30, 256  ;;  %p982_p2 = scmp.lt.s32.totalorder %s54_s30, %s54_s30 }
  0x24   :  { %p978_p1 = scmp.ne.s32.totalorder %s54_s30, %s977_s7  ;;  %p983_p3 = scmp.lt.s32.totalorder %s977_s7, %s977_s7 }
  0x26   :  { %p984_p4 = por %p983_p3, %p982_p2 }
  0x28   :  { %p985_p5 = pnand %p984_p4, %p978_p1 }
  0x2a   :  { %988 = shalt.err (!%p985_p5)
}
  0x2b   :  { %56 = dma.hbm_to_vmem [thread:$0]  %s1309_s3, 256, %s54_s30, [#allocation12]  }
  0x2c   :  { %1009 = dma.done.wait [#allocation6], 4096  }
  0x2d   :  { %1010 = vsyncadd [#allocation6], 4294963200 }
  0x2e   :  { %1011 = dma.done.wait [#allocation9], 4352  }
  0x2f   :  { %1012 = vsyncadd [#allocation9], 4294962944 }
  0x30   :  { %1013 = dma.done.wait [#allocation12], 256  }
  0x31   :  { %1014 = vsyncadd [#allocation12], 4294967040  ;;  %v117_v0 = vlaneseq  ;;  %vm76_vm0 = vcmask 7168   ;;  %v1023_v1 = vmov 0.0   ;;  %v80_v5 = vld [vmem:[#allocation11] sm:$0xff]  ;;  %v81_v6 = vld [vmem:[#allocation11 + $0x8] sm:$0xff] }
  0x32   :  { %77 = vst.msk [vmem:[#allocation4] sm:$0xff] %vm76_vm0, %v1023_v1  ;;  %868 = vmatprep.subr.mxu0 %v1023_v1  ;;  %v78_v7 = vld [vmem:[#allocation10] sm:$0xff]  ;;  %v597_v9 = vadd.f32 %v81_v6, %v80_v5  ;;  %v79_v10 = vld [vmem:[#allocation10 + $0x8] sm:$0xff]  ;;  %v87_v12 = vld [vmem:[#allocation5 + $0x10] sm:$0xff]  ;;  %vm73_vm1 = vcmask 130048   ;;  %vm274_vm2 = vcmask 130112  }
  0x33   :  { %v1068_v2 = vshrl.u32 %v117_v0, 7  ;;  %v1073_v11 = vmul.f32 %v80_v5, %v78_v7  ;;  %v88_v13 = vld [vmem:[#allocation5 + $0x18] sm:$0xff]  ;;  %v1075_v14 = vmul.f32 %v81_v6, %v79_v10  ;;  %v85_v15 = vld [vmem:[#allocation5] sm:$0xff]  ;;  %v86_v16 = vld [vmem:[#allocation5 + $0x8] sm:$0xff]  ;;  %74 = vst.msk [vmem:[#allocation2] sm:$0xff] %vm73_vm1, %v1023_v1  ;;  %vm361_vm3 = vcmask 1040384  }
  0x34   :  { %v89_v17 = vld [vmem:[#allocation5 + $0x20] sm:$0xff]  ;;  %598 = vadd.xlane.f32.xlu0 %v597_v9  ;;  %v90_v19 = vld [vmem:[#allocation5 + $0x28] sm:$0xff]  ;;  %v91_v21 = vld [vmem:[#allocation5 + $0x30] sm:$0xff]  ;;  %75 = vst.msk [vmem:[#allocation3] sm:$0xff] %vm73_vm1, %v1023_v1  ;;  %vm363_vm4 = vcmask 1041408   ;;  %vm365_vm5 = vcmask 1042432  }
  0x35   :  { %v119_v3 = vsub.s32 0, %v1068_v2  ;;  %v137_v4 = vsub.s32 1, %v1068_v2  ;;  %v155_v8 = vsub.s32 2, %v1068_v2  ;;  %v92_v22 = vld [vmem:[#allocation5 + $0x38] sm:$0xff]  ;;  %v173_v23 = vsub.s32 3, %v1068_v2  ;;  %v93_v36 = vld [vmem:[#allocation5 + $0x40] sm:$0xff] }
  0x36   :  { %v94_v37 = vld [vmem:[#allocation5 + $0x48] sm:$0xff]  ;;  %v95_v38 = vld [vmem:[#allocation5 + $0x50] sm:$0xff]  ;;  %v96_v39 = vld [vmem:[#allocation5 + $0x58] sm:$0xff]  ;;  %v191_v43 = vsub.s32 4, %v1068_v2  ;;  %vm367_vm6 = vcmask 1043456   ;;  %vm369_vm7 = vcmask 1044480  }
  0x37   :  { %v1078_v18 = vrot.slane %v1073_v11, %v119_v3  ;;  %v1081_v20 = vrot.slane %v1073_v11, %v137_v4  ;;  %v1085_v24 = vrot.slane %v1075_v14, %v119_v3  ;;  %v1088_v25 = vrot.slane %v1075_v14, %v137_v4  ;;  %v97_v47 = vld [vmem:[#allocation5 + $0x60] sm:$0xff]  ;;  %v98_v52 = vld [vmem:[#allocation5 + $0x68] sm:$0xff]  ;;  %v99_v53 = vld [vmem:[#allocation5 + $0x70] sm:$0xff]  ;;  %s1026_s11 = smov [#allocation13]  }
  0x38   :  { %v1091_v26 = vrot.slane %v1073_v11, %v155_v8  ;;  %v1094_v27 = vrot.slane %v1075_v14, %v155_v8  ;;  %v1105_v42 = vrot.slane %v1073_v11, %v173_v23  ;;  %v1112_v48 = vrot.slane %v1075_v14, %v173_v23  ;;  %v100_v54 = vld [vmem:[#allocation5 + $0x78] sm:$0xff]  ;;  %v101_v62 = vld [vmem:[#allocation5 + $0x80] sm:$0xff]  ;;  %v102_v3 = vld [vmem:[#allocation5 + $0x88] sm:$0xff]  ;;  %s852_s12 = sshll.u32 %s1026_s11, 4  ;;  %s853_s12 = int_to_ptr.vmem [resolvable:$true] %s852_s12 }
  0x39   :  { %v127_v28 = vmul.f32 %v1078_v18, %v87_v12  ;;  %v125_v29 = vmul.f32 %v1078_v18, %v85_v15  ;;  %v143_v30 = vmul.f32 %v1081_v20, %v89_v17  ;;  %v145_v31 = vmul.f32 %v1081_v20, %v91_v21  ;;  %v103_v4 = vld [vmem:[#allocation5 + $0x90] sm:$0xff]  ;;  %v104_v5 = vld [vmem:[#allocation5 + $0x98] sm:$0xff]  ;;  %v380_v15 = vld [vmem:[#allocation8 + $0x8] sm:$0xff]  ;;  %s989_s13 = scalar_lea.vmem %s853_s12, 16  ;;  %s993_s14 = scalar_lea.vmem %s853_s12, 32 }
  0x3a   :  { %v128_v32 = vmul.f32 %v1085_v24, %v88_v13  ;;  %v126_v33 = vmul.f32 %v1085_v24, %v86_v16  ;;  %v144_v34 = vmul.f32 %v1088_v25, %v90_v19  ;;  %v146_v35 = vmul.f32 %v1088_v25, %v92_v22  ;;  %v379_v13 = vld [vmem:[#allocation8] sm:$0xff]  ;;  %v381_v16 = vld [vmem:[#allocation8 + $0x10] sm:$0xff]  ;;  %v382_v17 = vld [vmem:[#allocation8 + $0x18] sm:$0xff]  ;;  %p990_p6 = scmp.ne.s32.totalorder %s853_s12, %s989_s13  ;;  %p994_p7 = scmp.lt.s32.totalorder %s853_s12, %s853_s12 }
  0x3b   :  { %v161_v44 = vmul.f32 %v1091_v26, %v93_v36  ;;  %v162_v45 = vmul.f32 %v1094_v27, %v94_v37  ;;  %v163_v46 = vmul.f32 %v1091_v26, %v95_v38  ;;  %v164_v51 = vmul.f32 %v1094_v27, %v96_v39  ;;  %p995_p8 = scmp.lt.s32.totalorder %s993_s14, %s989_s13 }
  0x3c   :  { %v132_v40 = vadd.f32 %v128_v32, %v127_v28  ;;  %v129_v41 = vadd.f32 %v126_v33, %v125_v29  ;;  %v147_v49 = vadd.f32 %v144_v34, %v143_v30  ;;  %v150_v50 = vadd.f32 %v146_v35, %v145_v31  ;;  %v383_v28 = vld [vmem:[#allocation8 + $0x20] sm:$0xff]  ;;  %v384_v33 = vld [vmem:[#allocation8 + $0x28] sm:$0xff]  ;;  %v385_v34 = vld [vmem:[#allocation8 + $0x30] sm:$0xff] }
  0x3d   :  { %v179_v55 = vmul.f32 %v1105_v42, %v97_v47  ;;  %v180_v56 = vmul.f32 %v1112_v48, %v98_v52  ;;  %v181_v57 = vmul.f32 %v1105_v42, %v99_v53  ;;  %v182_v58 = vmul.f32 %v1112_v48, %v100_v54  ;;  %v386_v35 = vld [vmem:[#allocation8 + $0x38] sm:$0xff]  ;;  %v388_v54 = vld [vmem:[#allocation8 + $0x48] sm:$0xff]  ;;  %p996_p9 = por %p995_p8, %p994_p7 }
  0x3e   :  { %133 = vadd.xlane.f32.xlu1 %v132_v40  ;;  %130 = vadd.xlane.f32.xlu0 %v129_v41  ;;  %v1120_v59 = vrot.slane %v1073_v11, %v191_v43  ;;  %v165_v60 = vadd.f32 %v162_v45, %v161_v44  ;;  %v168_v61 = vadd.f32 %v164_v51, %v163_v46  ;;  %v1024_v19 = vmov 0   ;;  %v106_v44 = vld [vmem:[#allocation5 + $0xa8] sm:$0xff]  ;;  %v107_v45 = vld [vmem:[#allocation5 + $0xb0] sm:$0xff]  ;;  %v108_v46 = vld [vmem:[#allocation5 + $0xb8] sm:$0xff] }
  0x3f   :  { %v1123_v63 = vrot.slane %v1075_v14, %v191_v43  ;;  %v183_v6 = vadd.f32 %v180_v56, %v179_v55  ;;  %v186_v7 = vadd.f32 %v182_v58, %v181_v57  ;;  %891 = vset.pattern.permute.xlu1 %v1024_v19  ;;  %892 = vset.pattern.permute.xlu0 %v1024_v19  ;;  %v209_v29 = vsub.s32 5, %v1068_v2  ;;  %v105_v43 = vld [vmem:[#allocation5 + $0xa0] sm:$0xff]  ;;  %v389_v55 = vld [vmem:[#allocation8 + $0x50] sm:$0xff]  ;;  %v390_v56 = vld [vmem:[#allocation8 + $0x58] sm:$0xff]  ;;  %p997_p10 = pnand %p996_p9, %p990_p6 }
  0x40   :  { %v197_v8 = vmul.f32 %v1120_v59, %v101_v62  ;;  %v199_v10 = vmul.f32 %v1120_v59, %v103_v4  ;;  %v411_v21 = vmul.f32 %v379_v13, %v1078_v18  ;;  %v412_v22 = vmul.f32 %v380_v15, %v1085_v24  ;;  %v391_v13 = vld [vmem:[#allocation8 + $0x60] sm:$0xff]  ;;  %v392_v19 = vld [vmem:[#allocation8 + $0x68] sm:$0xff] }
  0x41   :  { %v198_v9 = vmul.f32 %v1123_v63, %v102_v3  ;;  %v200_v12 = vmul.f32 %v1123_v63, %v104_v5  ;;  %v413_v23 = vmul.f32 %v381_v16, %v1078_v18  ;;  %v414_v32 = vmul.f32 %v382_v17, %v1085_v24  ;;  %v109_v5 = vld [vmem:[#allocation5 + $0xc0] sm:$0xff] }
  0x42   :  { %148 = vadd.xlane.f32.xlu1 %v147_v49  ;;  %151 = vadd.xlane.f32.xlu0 %v150_v50  ;;  %v421_v36 = vmul.f32 %v383_v28, %v1081_v20  ;;  %v422_v37 = vmul.f32 %v384_v33, %v1088_v25  ;;  %v423_v38 = vmul.f32 %v385_v34, %v1081_v20  ;;  %v387_v50 = vld [vmem:[#allocation8 + $0x40] sm:$0xff]  ;;  %vm371_vm8 = vcmask 1045504  }
  0x43   :  { %v201_v30 = vadd.f32 %v198_v9, %v197_v8  ;;  %v204_v31 = vadd.f32 %v200_v12, %v199_v10  ;;  %v424_v18 = vmul.f32 %v386_v35, %v1088_v25  ;;  %v1139_v39 = vrot.slane %v1073_v11, %v209_v29  ;;  %v111_v8 = vld [vmem:[#allocation5 + $0xd0] sm:$0xff]  ;;  %v112_v9 = vld [vmem:[#allocation5 + $0xd8] sm:$0xff]  ;;  %v113_v34 = vld [vmem:[#allocation5 + $0xe0] sm:$0xff] }
  0x44   :  { %v415_v40 = vadd.f32 %v412_v22, %v411_v21  ;;  %v418_v41 = vadd.f32 %v414_v32, %v413_v23  ;;  %v1142_v24 = vrot.slane %v1075_v14, %v209_v29  ;;  %v425_v47 = vadd.f32 %v422_v37, %v421_v36  ;;  %v393_v21 = vld [vmem:[#allocation8 + $0x70] sm:$0xff]  ;;  %v394_v22 = vld [vmem:[#allocation8 + $0x78] sm:$0xff]  ;;  %v114_v36 = vld [vmem:[#allocation5 + $0xe8] sm:$0xff] }
  0x45   :  { %v428_v49 = vadd.f32 %v424_v18, %v423_v38  ;;  %v215_v20 = vmul.f32 %v1139_v39, %v105_v43  ;;  %v227_v25 = vsub.s32 6, %v1068_v2  ;;  %v217_v52 = vmul.f32 %v1139_v39, %v107_v45  ;;  %v115_v37 = vld [vmem:[#allocation5 + $0xf0] sm:$0xff]  ;;  %v116_v38 = vld [vmem:[#allocation5 + $0xf8] sm:$0xff]  ;;  %v395_v43 = vld [vmem:[#allocation8 + $0x80] sm:$0xff] }
  0x46   :  { %166 = vadd.xlane.f32.xlu1 %v165_v60  ;;  %169 = vadd.xlane.f32.xlu0 %v168_v61  ;;  %v216_v51 = vmul.f32 %v1142_v24, %v106_v44  ;;  %v218_v53 = vmul.f32 %v1142_v24, %v108_v46  ;;  %v431_v57 = vmul.f32 %v387_v50, %v1091_v26  ;;  %v396_v44 = vld [vmem:[#allocation8 + $0x88] sm:$0xff]  ;;  %v397_v45 = vld [vmem:[#allocation8 + $0x90] sm:$0xff]  ;;  %v398_v46 = vld [vmem:[#allocation8 + $0x98] sm:$0xff]  ;;  %vm373_vm9 = vcmask 1046528  }
  0x47   :  { %v432_v58 = vmul.f32 %v388_v54, %v1094_v27  ;;  %v433_v60 = vmul.f32 %v389_v55, %v1091_v26  ;;  %v434_v61 = vmul.f32 %v390_v56, %v1094_v27  ;;  %v1154_v62 = vrot.slane %v1073_v11, %v227_v25  ;;  %v402_v54 = vld [vmem:[#allocation8 + $0xb8] sm:$0xff] }
  0x48   :  { %v219_v3 = vadd.f32 %v216_v51, %v215_v20  ;;  %v222_v4 = vadd.f32 %v218_v53, %v217_v52  ;;  %v245_v27 = vsub.s32 7, %v1068_v2  ;;  %v441_v23 = vmul.f32 %v391_v13, %v1105_v42  ;;  %v399_v51 = vld [vmem:[#allocation8 + $0xa0] sm:$0xff]  ;;  %v400_v52 = vld [vmem:[#allocation8 + $0xa8] sm:$0xff]  ;;  %v401_v53 = vld [vmem:[#allocation8 + $0xb0] sm:$0xff] }
  0x49   :  { %v435_v10 = vadd.f32 %v432_v58, %v431_v57  ;;  %v438_v12 = vadd.f32 %v434_v61, %v433_v60  ;;  %v233_v26 = vmul.f32 %v1154_v62, %v109_v5  ;;  %v235_v16 = vmul.f32 %v1154_v62, %v111_v8  ;;  %v403_v61 = vld [vmem:[#allocation8 + $0xc0] sm:$0xff]  ;;  %v409_v13 = vld [vmem:[#allocation8 + $0xf0] sm:$0xff] }
  0x4a   :  { %184 = vadd.xlane.f32.xlu1 %v183_v6  ;;  %187 = vadd.xlane.f32.xlu0 %v186_v7  ;;  %v1157_v6 = vrot.slane %v1075_v14, %v227_v25  ;;  %v110_v7 = vld [vmem:[#allocation5 + $0xc8] sm:$0xff]  ;;  %v442_v28 = vmul.f32 %v392_v19, %v1112_v48  ;;  %v443_v29 = vmul.f32 %v393_v21, %v1105_v42  ;;  %vm1025_vm10 = vmmov 0  }
  0x4b   :  { %v250_v35 = vrot.slane %v1075_v14, %v245_v27  ;;  %v452_v14 = vmul.f32 %v396_v44, %v1123_v63  ;;  %v454_v25 = vmul.f32 %v398_v46, %v1123_v63  ;;  %v461_v56 = vmul.f32 %v399_v51, %v1139_v39  ;;  %v406_v63 = vld [vmem:[#allocation8 + $0xd8] sm:$0xff]  ;;  %870 = vmatprep.mubr.msk.f32.mxu0 %vm1025_vm10, %v1023_v1 }
  0x4c   :  { %v234_v15 = vmul.f32 %v1157_v6, %v110_v7  ;;  %v236_v17 = vmul.f32 %v1157_v6, %v112_v9  ;;  %v445_v18 = vadd.f32 %v442_v28, %v441_v23  ;;  %v462_v57 = vmul.f32 %v400_v52, %v1142_v24 }
  0x4d   :  { %v252_v42 = vmul.f32 %v250_v35, %v114_v36  ;;  %v464_v60 = vmul.f32 %v402_v54, %v1142_v24  ;;  %v471_v7 = vmul.f32 %v403_v61, %v1154_v62  ;;  %v410_v24 = vld [vmem:[#allocation8 + $0xf8] sm:$0xff]  ;;  %vm722_vm12 = vcmask 64512  }
  0x4e   :  { %202 = vadd.xlane.f32.xlu1 %v201_v30  ;;  %205 = vadd.xlane.f32.xlu0 %v204_v31  ;;  %v444_v30 = vmul.f32 %v394_v22, %v1112_v48  ;;  %v1169_v31 = vrot.slane %v1073_v11, %v245_v27  ;;  %v237_v32 = vadd.f32 %v234_v15, %v233_v26  ;;  %v407_v26 = vld [vmem:[#allocation8 + $0xe0] sm:$0xff]  ;;  %v596_v22 = vld [vmem:[#allocation4] sm:$0xff] }
  0x4f   :  { %v240_v33 = vadd.f32 %v236_v17, %v235_v16  ;;  %v254_v48 = vmul.f32 %v250_v35, %v116_v38  ;;  %v465_v5 = vadd.f32 %v462_v57, %v461_v56  ;;  %v484_v21 = vmul.f32 %v410_v24, %v250_v35 }
  0x50   :  { %v253_v11 = vmul.f32 %v1169_v31, %v115_v37  ;;  %v481_v15 = vmul.f32 %v407_v26, %v1169_v31  ;;  %v483_v19 = vmul.f32 %v409_v13, %v1169_v31  ;;  %v1194_v37 = vand.u32 127, %v117_v0 }
  0x52   :  { %416 = vadd.xlane.f32.xlu1 %v415_v40  ;;  %419 = vadd.xlane.f32.xlu0 %v418_v41  ;;  %v448_v40 = vadd.f32 %v444_v30, %v443_v29  ;;  %v251_v41 = vmul.f32 %v1169_v31, %v113_v34  ;;  %v258_v50 = vadd.f32 %v254_v48, %v253_v11  ;;  %vm713_vm11 = vcmp.lt.s32.totalorder %v1194_v37, 8 }
  0x53   :  { %v1202_v48 = vsub.s32 %v1194_v37, %v1068_v2  ;;  %vm717_vm13 = vcmp.eq.s32.totalorder %v1068_v2, %v1194_v37  ;;  %vm826_vm15 = vcmp.eq.s32.totalorder %v1194_v37, 0 }
  0x54   :  { %v255_v20 = vadd.f32 %v252_v42, %v251_v41 }
  0x56   :  { %426 = vadd.xlane.f32.xlu1 %v425_v47  ;;  %429 = vadd.xlane.f32.xlu0 %v428_v49  ;;  %v451_v47 = vmul.f32 %v395_v43, %v1120_v59  ;;  %v453_v49 = vmul.f32 %v397_v45, %v1120_v59  ;;  %v463_v59 = vmul.f32 %v401_v53, %v1139_v39  ;;  %v408_v39 = vld [vmem:[#allocation8 + $0xe8] sm:$0xff] }
  0x57   :  { %v482_v16 = vmul.f32 %v408_v39, %v250_v35 }
  0x58   :  { %v455_v55 = vadd.f32 %v452_v14, %v451_v47  ;;  %v458_v58 = vadd.f32 %v454_v25, %v453_v49  ;;  %v468_v9 = vadd.f32 %v464_v60, %v463_v59 }
  0x5a   :  { %220 = vadd.xlane.f32.xlu1 %v219_v3  ;;  %223 = vadd.xlane.f32.xlu0 %v222_v4  ;;  %v404_v3 = vld [vmem:[#allocation8 + $0xc8] sm:$0xff]  ;;  %v405_v4 = vld [vmem:[#allocation8 + $0xd0] sm:$0xff] }
  0x5b   :  { %v472_v8 = vmul.f32 %v404_v3, %v1157_v6 }
  0x5d   :  { %v475_v27 = vadd.f32 %v472_v8, %v471_v7 }
  0x5e   :  { %436 = vadd.xlane.f32.xlu1 %v435_v10  ;;  %439 = vadd.xlane.f32.xlu0 %v438_v12  ;;  %v473_v10 = vmul.f32 %v405_v4, %v1154_v62  ;;  %v474_v12 = vmul.f32 %v406_v63, %v1157_v6  ;;  %v485_v62 = vadd.f32 %v482_v16, %v481_v15 }
  0x5f   :  { %v488_v6 = vadd.f32 %v484_v21, %v483_v19 }
  0x60   :  { %v478_v17 = vadd.f32 %v474_v12, %v473_v10 }
  0x62   :  { %238 = vadd.xlane.f32.xlu1 %v237_v32  ;;  %241 = vadd.xlane.f32.xlu0 %v240_v33 }
  0x66   :  { %446 = vadd.xlane.f32.xlu1 %v445_v18  ;;  %449 = vadd.xlane.f32.xlu0 %v448_v40  ;;  %v269_v40 = vadd.s32 4294967288, %v1194_v37 }
  0x68   :  { %v1198_v11 = vsub.s32 %v269_v40, %v1068_v2  ;;  %v84_v40 = vld [vmem:[#allocation2] sm:$0xff] }
  0x6a   :  { %256 = vadd.xlane.f32.xlu1 %v255_v20  ;;  %259 = vadd.xlane.f32.xlu0 %v258_v50 }
  0x6e   :  { %456 = vadd.xlane.f32.xlu1 %v455_v55  ;;  %459 = vadd.xlane.f32.xlu0 %v458_v58 }
  0x72   :  { %466 = vadd.xlane.f32.xlu1 %v465_v5  ;;  %469 = vadd.xlane.f32.xlu0 %v468_v9 }
  0x76   :  { %476 = vadd.xlane.f32.xlu1 %v475_v27  ;;  %479 = vadd.xlane.f32.xlu0 %v478_v17 }
  0x7a   :  { %486 = vadd.xlane.f32.xlu1 %v485_v62  ;;  %489 = vadd.xlane.f32.xlu0 %v488_v6 }
  0xbd   :  { %v599_v23 = vpop.xlane.xlu0 %598 }
  0xbe   :  { %v600_v28 = vadd.f32 %v599_v23, %v596_v22 }
  0xc0   :  { %602 = vst.msk [vmem:[#allocation4] sm:$0xff] %vm76_vm0, %v600_v28 }
  0xc7   :  { %v134_v29 = vpop.xlane.xlu1 %133  ;;  %v131_v30 = vpop.xlane.xlu0 %130  ;;  %v608_v31 = vld [vmem:[#allocation4] sm:$0xff] }
  0xc8   :  { %v609_v32 = vmax.f32 %v608_v31, 1.0  ;;  %v273_v0 = vrot.slane %v134_v29, %v1198_v11  ;;  %v268_v46 = vrot.slane %v131_v30, %v1202_v48 }
  0xca   :  { %893 = vrcp.f32 %v609_v32  ;;  %v275_v51 = vsel %vm274_vm2, %v273_v0, %v268_v46 }
  0xcb   :  { %v149_v33 = vpop.xlane.xlu1 %148  ;;  %v152_v34 = vpop.xlane.xlu0 %151 }
  0xcc   :  { %v282_v47 = vrot.slane %v149_v33, %v1202_v48  ;;  %v286_v14 = vrot.slane %v152_v34, %v1198_v11 }
  0xce   :  { %v287_v52 = vsel %vm274_vm2, %v286_v14, %v282_v47 }
  0xcf   :  { %v167_v35 = vpop.xlane.xlu1 %166  ;;  %v170_v36 = vpop.xlane.xlu0 %169  ;;  %v362_v57 = vsel %vm361_vm3, %v275_v51, %v287_v52 }
  0xd0   :  { %v294_v50 = vrot.slane %v167_v35, %v1202_v48  ;;  %v298_v25 = vrot.slane %v170_v36, %v1198_v11 }
  0xd2   :  { %v299_v58 = vsel %vm274_vm2, %v298_v25, %v294_v50 }
  0xd3   :  { %v185_v38 = vpop.xlane.xlu1 %184  ;;  %v188_v18 = vpop.xlane.xlu0 %187  ;;  %v364_v61 = vsel %vm363_vm4, %v362_v57, %v299_v58 }
  0xd4   :  { %v306_v53 = vrot.slane %v185_v38, %v1202_v48  ;;  %v310_v54 = vrot.slane %v188_v18, %v1198_v11 }
  0xd6   :  { %v311_v3 = vsel %vm274_vm2, %v310_v54, %v306_v53 }
  0xd7   :  { %v203_v41 = vpop.xlane.xlu1 %202  ;;  %v206_v42 = vpop.xlane.xlu0 %205  ;;  %v366_v8 = vsel %vm365_vm5, %v364_v61, %v311_v3 }
  0xd8   :  { %v894_v43 = vpop.eup %893  ;;  %v318_v59 = vrot.slane %v203_v41, %v1202_v48  ;;  %v322_v60 = vrot.slane %v206_v42, %v1198_v11 }
  0xd9   :  { %613 = vperm.xlu1 %891, %v894_v43  }
  0xda   :  { %v323_v9 = vsel %vm274_vm2, %v322_v60, %v318_v59 }
  0xdb   :  { %v417_v44 = vpop.xlane.xlu1 %416  ;;  %v420_v45 = vpop.xlane.xlu0 %419  ;;  %v368_v16 = vsel %vm367_vm6, %v366_v8, %v323_v9 }
  0xdc   :  { %v496_v10 = vrot.slane %v417_v44, %v1202_v48  ;;  %v500_v12 = vrot.slane %v420_v45, %v1198_v11 }
  0xde   :  { %v501_v22 = vsel %vm274_vm2, %v500_v12, %v496_v10 }
  0xdf   :  { %v427_v49 = vpop.xlane.xlu1 %426  ;;  %v430_v20 = vpop.xlane.xlu0 %429 }
  0xe0   :  { %v508_v13 = vrot.slane %v427_v49, %v1202_v48  ;;  %v512_v24 = vrot.slane %v430_v20, %v1198_v11 }
  0xe2   :  { %v513_v23 = vsel %vm274_vm2, %v512_v24, %v508_v13 }
  0xe3   :  { %v221_v55 = vpop.xlane.xlu1 %220  ;;  %v224_v56 = vpop.xlane.xlu0 %223  ;;  %v587_v30 = vsel %vm361_vm3, %v501_v22, %v513_v23  ;;  %vm842_vm3 = vcmp.eq.s32.totalorder %v1194_v37, 4 }
  0xe4   :  { %v330_v5 = vrot.slane %v221_v55, %v1202_v48  ;;  %v334_v7 = vrot.slane %v224_v56, %v1198_v11 }
  0xe6   :  { %v335_v17 = vsel %vm274_vm2, %v334_v7, %v330_v5  ;;  %v378_v7 = vld [vmem:[#allocation3] sm:$0xff] }
  0xe7   :  { %v437_v4 = vpop.xlane.xlu1 %436  ;;  %v440_v63 = vpop.xlane.xlu0 %439  ;;  %v370_v28 = vsel %vm369_vm7, %v368_v16, %v335_v17 }
  0xe8   :  { %v520_v19 = vrot.slane %v437_v4, %v1202_v48  ;;  %v524_v21 = vrot.slane %v440_v63, %v1198_v11 }
  0xea   :  { %v525_v31 = vsel %vm274_vm2, %v524_v21, %v520_v19 }
  0xeb   :  { %v239_v26 = vpop.xlane.xlu1 %238  ;;  %v242_v39 = vpop.xlane.xlu0 %241  ;;  %v588_v42 = vsel %vm363_vm4, %v587_v30, %v525_v31 }
  0xec   :  { %v342_v27 = vrot.slane %v239_v26, %v1202_v48  ;;  %v346_v15 = vrot.slane %v242_v39, %v1198_v11 }
  0xee   :  { %v347_v29 = vsel %vm274_vm2, %v346_v15, %v342_v27 }
  0xef   :  { %v447_v62 = vpop.xlane.xlu1 %446  ;;  %v450_v6 = vpop.xlane.xlu0 %449  ;;  %v372_v32 = vsel %vm371_vm8, %v370_v28, %v347_v29 }
  0xf0   :  { %v532_v35 = vrot.slane %v447_v62, %v1202_v48  ;;  %v536_v36 = vrot.slane %v450_v6, %v1198_v11 }
  0xf2   :  { %v537_v0 = vsel %vm274_vm2, %v536_v36, %v532_v35 }
  0xf3   :  { %v257_v33 = vpop.xlane.xlu1 %256  ;;  %v260_v34 = vpop.xlane.xlu0 %259  ;;  %v589_v49 = vsel %vm365_vm5, %v588_v42, %v537_v0  ;;  %v719_v0 = vsel %vm717_vm13, 1.0, %v1023_v1 }
  0xf4   :  { %v354_v38 = vrot.slane %v257_v33, %v1202_v48  ;;  %v358_v18 = vrot.slane %v260_v34, %v1198_v11 }
  0xf6   :  { %v359_v41 = vsel %vm274_vm2, %v358_v18, %v354_v38 }
  0xf7   :  { %v374_v43 = vsel %vm373_vm9, %v372_v32, %v359_v41  ;;  %v457_v44 = vpop.xlane.xlu1 %456  ;;  %v460_v45 = vpop.xlane.xlu0 %459 }
  0xf8   :  { %v375_v46 = vadd.f32 %v374_v43, %v84_v40  ;;  %v544_v47 = vrot.slane %v457_v44, %v1202_v48  ;;  %v548_v14 = vrot.slane %v460_v45, %v1198_v11 }
  0xfa   :  { %377 = vst.msk [vmem:[#allocation2] sm:$0xff] %vm73_vm1, %v375_v46  ;;  %v549_v20 = vsel %vm274_vm2, %v548_v14, %v544_v47 }
  0xfb   :  { %v467_v50 = vpop.xlane.xlu1 %466  ;;  %v470_v25 = vpop.xlane.xlu0 %469  ;;  %v590_v53 = vsel %vm367_vm6, %v589_v49, %v549_v20  ;;  %v716_v20 = vsel %vm713_vm11, 1.0, %v1023_v1 }
  0xfc   :  { %v556_v51 = vrot.slane %v467_v50, %v1202_v48  ;;  %v560_v52 = vrot.slane %v470_v25, %v1198_v11 }
  0xfe   :  { %v561_v54 = vsel %vm274_vm2, %v560_v52, %v556_v51 }
  0xff   :  { %v477_v55 = vpop.xlane.xlu1 %476  ;;  %v480_v56 = vpop.xlane.xlu0 %479  ;;  %v591_v59 = vsel %vm369_vm7, %v590_v53, %v561_v54 }
 0x100   :  { %v568_v57 = vrot.slane %v477_v55, %v1202_v48  ;;  %v572_v58 = vrot.slane %v480_v56, %v1198_v11 }
 0x101   :  { %v606_v26 = vld [vmem:[#allocation2] sm:$0xff] }
 0x102   :  { %v573_v60 = vsel %vm274_vm2, %v572_v58, %v568_v57 }
 0x103   :  { %v487_v61 = vpop.xlane.xlu1 %486  ;;  %v490_v3 = vpop.xlane.xlu0 %489  ;;  %v592_v4 = vsel %vm371_vm8, %v591_v59, %v573_v60 }
 0x104   :  { %v580_v63 = vrot.slane %v487_v61, %v1202_v48  ;;  %v584_v5 = vrot.slane %v490_v3, %v1198_v11 }
 0x106   :  { %v585_v8 = vsel %vm274_vm2, %v584_v5, %v580_v63  ;;  %vm839_vm2 = vcmp.eq.s32.totalorder %v1194_v37, 3 }
 0x107   :  { %v593_v9 = vsel %vm373_vm9, %v592_v4, %v585_v8 }
 0x108   :  { %v594_v10 = vadd.f32 %v593_v9, %v378_v7 }
 0x10a   :  { %595 = vst.msk [vmem:[#allocation3] sm:$0xff] %vm73_vm1, %v594_v10 }
 0x111   :  { %v607_v39 = vld [vmem:[#allocation3] sm:$0xff] }
 0x154   :  { %v614_v12 = vpop.permute.xlu1 %613 }
 0x155   :  { %v616_v13 = vmul.f32 %v614_v12, %v606_v26  ;;  %v617_v24 = vmul.f32 %v614_v12, %v607_v39 }
 0x157   :  { %v621_v27 = vmul.f32 %v616_v13, %v616_v13  ;;  %v628_v16 = vmul.f32 %v617_v24, %v617_v24  ;;  %vm618_vm14 = vcmp.ne.f32.partialorder %v617_v24, 0.0 }
 0x158   :  { %v863_v52 = vsel %vm618_vm14, 1.0, %v1023_v1 }
 0x159   :  { %v622_v15 = vsel %vm73_vm1, %v621_v27, 0.0  ;;  %v629_v11 = vsel %vm73_vm1, %v628_v16, 0.0  ;;  %v748_v54 = vsel %vm76_vm0, %v863_v52, 0.0 }
 0x15a   :  { %623 = vadd.xlane.f32.xlu0 %v622_v15  ;;  %v749_v55 = vrot.slane %v748_v54, 4 }
 0x15c   :  { %v750_v57 = vadd.f32 %v749_v55, %v748_v54 }
 0x15e   :  { %630 = vadd.xlane.f32.xlu0 %v629_v11  ;;  %v751_v61 = vrot.slane %v750_v57, 2 }
 0x160   :  { %v752_v10 = vadd.f32 %v751_v61, %v750_v57 }
 0x162   :  { %v753_v16 = vrot.slane %v752_v10, 1 }
 0x1e3   :  { %v624_v48 = vpop.xlane.xlu0 %623 }
 0x1e4   :  { %v625_v17 = vmax.f32 %v624_v48, 1e-24 }
 0x1e6   :  { %895 = vrsqrt.f32 %v625_v17 }
 0x1e7   :  { %v631_v19 = vpop.xlane.xlu0 %630 }
 0x1e8   :  { %v632_v21 = vmax.f32 %v631_v19, 1e-24 }
 0x1ea   :  { %897 = vrsqrt.f32 %v632_v21 }
 0x1f3   :  { %v896_v62 = vpop.eup %895 }
 0x1f4   :  { %v627_v6 = vmul.f32 %v896_v62, %v616_v13 }
 0x1f6   :  { %869 = vmatpush3.xpose.msk.msra.mxu0 %vm73_vm1, %v627_v6  ;;  %v754_v6 = vadd.f32 %v753_v16, %v752_v10 }
 0x1f7   :  { %v898_v22 = vpop.eup %897 }
 0x1f8   :  { %v634_v23 = vmul.f32 %v898_v22, %v617_v24 }
 0x1fa   :  { %871 = vmatmul.mubr.msk.f32.vlgmr.msra.gmra.mxu0 %vm73_vm1, %v634_v23  ;;  %vm836_vm1 = vcmp.eq.s32.totalorder %v1194_v37, 2 }
 0x2ba   :  { %v707_v28 = vpop.f32.mrf.mxu0 }
 0x2bb   :  { %v786_v29 = vsel %vm713_vm11, %v707_v28, -1e+30  ;;  %v720_v30 = vmul.f32 10.0, %v707_v28  ;;  %v757_v49 = vmul.f32 %v719_v0, %v707_v28  ;;  %v769_v50 = vmul.f32 %v716_v20, %v707_v28 }
 0x2bc   :  { %v872_v31 = vpop.f32.mrf.mxu0  ;;  %v787_v32 = vsel %vm722_vm12, %v786_v29, -inf }
 0x2bd   :  { %788 = vmax.xlane.f32.xlu0 %v787_v32  ;;  %v721_v33 = vsel %vm713_vm11, %v720_v30, -1e+30  ;;  %v758_v2 = vsel %vm722_vm12, %v757_v49, 0.0  ;;  %v770_v25 = vsel %vm722_vm12, %v769_v50, 0.0 }
 0x2be   :  { %v723_v34 = vsel %vm722_vm12, %v721_v33, -inf  ;;  %v735_v47 = vmul.f32 %v721_v33, %v719_v0 }
 0x2c0   :  { %v736_v14 = vsel %vm722_vm12, %v735_v47, 0.0 }
 0x2c1   :  { %724 = vmax.xlane.f32.xlu0 %v723_v34 }
 0x346   :  { %v789_v35 = vpop.xlane.xlu0 %788 }
 0x347   :  { %v790_v36 = vsub.f32 %v707_v28, %v789_v35 }
 0x349   :  { %v791_v38 = vmul.f32 1.442695, %v790_v36 }
 0x34a   :  { %v725_v18 = vpop.xlane.xlu0 %724 }
 0x34b   :  { %899 = vpow2.f32 %v791_v38  ;;  %v726_v40 = vsub.f32 %v721_v33, %v725_v18 }
 0x34d   :  { %v727_v41 = vmul.f32 1.442695, %v726_v40 }
 0x34f   :  { %901 = vpow2.f32 %v727_v41 }
 0x358   :  { %v900_v42 = vpop.eup %899 }
 0x359   :  { %v793_v43 = vsel %vm713_vm11, %v900_v42, 0.0 }
 0x35a   :  { %v794_v44 = vsel %vm722_vm12, %v793_v43, 0.0 }
 0x35b   :  { %795 = vadd.xlane.f32.xlu1 %v794_v44 }
 0x35c   :  { %v902_v45 = vpop.eup %901 }
 0x35d   :  { %v729_v46 = vsel %vm722_vm12, %v902_v45, 0.0 }
 0x35e   :  { %730 = vadd.xlane.f32.xlu0 %v729_v46 }
 0x362   :  { %737 = vadd.xlane.f32.xlu0 %v736_v14 }
 0x366   :  { %759 = vadd.xlane.f32.xlu0 %v758_v2 }
 0x36a   :  { %771 = vadd.xlane.f32.xlu0 %v770_v25 }
 0x3e4   :  { %v796_v51 = vpop.xlane.xlu1 %795 }
 0x3e5   :  { %903 = vrcp.f32 %v796_v51 }
 0x3e7   :  { %v731_v53 = vpop.xlane.xlu0 %730 }
 0x3e8   :  { %905 = vlog2.f32 %v731_v53 }
 0x3e9   :  { %907 = vrcp.f32 %v754_v6 }
 0x3eb   :  { %v738_v56 = vpop.xlane.xlu0 %737 }
 0x3ef   :  { %v760_v58 = vpop.xlane.xlu0 %759 }
 0x3f0   :  { %v761_v59 = vrot.slane %v760_v58, 4 }
 0x3f2   :  { %v904_v60 = vpop.eup %903  ;;  %v762_v3 = vadd.f32 %v761_v59, %v760_v58 }
 0x3f3   :  { %v772_v4 = vpop.xlane.xlu0 %771  ;;  %v798_v63 = vmul.f32 %v904_v60, %v793_v43 }
 0x3f4   :  { %v763_v5 = vrot.slane %v762_v3, 2  ;;  %v773_v7 = vrot.slane %v772_v4, 4 }
 0x3f5   :  { %v906_v8 = vpop.eup %905  ;;  %v799_v9 = vmul.f32 %v798_v63, %v719_v0  ;;  %v811_v13 = vmul.f32 %v798_v63, %v716_v20 }
 0x3f6   :  { %v733_v1 = vmul.f32 0.6931472, %v906_v8  ;;  %v774_v12 = vadd.f32 %v773_v7, %v772_v4  ;;  %v764_v26 = vadd.f32 %v763_v5, %v762_v3  ;;  %v908_v34 = vpop.eup %907 }
 0x3f7   :  { %v800_v39 = vsel %vm722_vm12, %v799_v9, 0.0  ;;  %v812_v19 = vsel %vm722_vm12, %v811_v13, 0.0 }
 0x3f8   :  { %v734_v24 = vadd.f32 %v733_v1, %v725_v18  ;;  %v775_v27 = vrot.slane %v774_v12, 2  ;;  %801 = vadd.xlane.f32.xlu0 %v800_v39  ;;  %v765_v15 = vrot.slane %v764_v26, 1 }
 0x3fa   :  { %v739_v11 = vsub.f32 %v734_v24, %v738_v56  ;;  %v766_v48 = vadd.f32 %v765_v15, %v764_v26  ;;  %v776_v17 = vadd.f32 %v775_v27, %v774_v12 }
 0x3fc   :  { %v740_v21 = vmul.f32 %v863_v52, %v739_v11  ;;  %813 = vadd.xlane.f32.xlu0 %v812_v19  ;;  %873 = vpush %v766_v48  ;;  %v777_v62 = vrot.slane %v776_v17, 1 }
 0x3fe   :  { %v741_v22 = vsel %vm76_vm0, %v740_v21, 0.0  ;;  %v778_v23 = vadd.f32 %v777_v62, %v776_v17  ;;  %vm833_vm0 = vcmp.eq.s32.totalorder %v1194_v37, 1 }
 0x3ff   :  { %v742_v28 = vrot.slane %v741_v22, 4 }
 0x400   :  { %875 = vpush %v778_v23 }
 0x401   :  { %v743_v29 = vadd.f32 %v742_v28, %v741_v22 }
 0x403   :  { %v744_v30 = vrot.slane %v743_v29, 2 }
 0x405   :  { %v745_v31 = vadd.f32 %v744_v30, %v743_v29 }
 0x407   :  { %v746_v32 = vrot.slane %v745_v31, 1 }
 0x409   :  { %v747_v33 = vadd.f32 %v746_v32, %v745_v31 }
 0x40b   :  { %v756_v35 = vmul.f32 %v908_v34, %v747_v33 }
 0x412   :  { %829 = vperm.xlu0 %892, %v756_v35  }
 0x42d   :  { %s874_s2 = spop %873 }
 0x42e   :  { %v768_v20 = vstv %s874_s2 }
 0x42f   :  { %v782_v25 = vmul.f32 0.125, %v768_v20 }
 0x431   :  { %s876_s3 = spop %875  ;;  %v834_v55 = vsel %vm833_vm0, %v782_v25, 0.0 }
 0x432   :  { %v780_v2 = vstv %s876_s3 }
 0x433   :  { %v783_v51 = vsub.f32 %v780_v2, %v768_v20 }
 0x435   :  { %v785_v54 = vmul.f32 0.017857144, %v783_v51 }
 0x437   :  { %v837_v59 = vsel %vm836_vm1, %v785_v54, 0.0 }
 0x481   :  { %v802_v36 = vpop.xlane.xlu0 %801 }
 0x482   :  { %v803_v38 = vrot.slane %v802_v36, 4 }
 0x484   :  { %v804_v18 = vadd.f32 %v803_v38, %v802_v36 }
 0x485   :  { %v814_v40 = vpop.xlane.xlu0 %813 }
 0x486   :  { %v805_v41 = vrot.slane %v804_v18, 2  ;;  %v815_v42 = vrot.slane %v814_v40, 4 }
 0x488   :  { %v816_v43 = vadd.f32 %v815_v42, %v814_v40  ;;  %v806_v44 = vadd.f32 %v805_v41, %v804_v18 }
 0x48a   :  { %v817_v45 = vrot.slane %v816_v43, 2  ;;  %v807_v0 = vrot.slane %v806_v44, 1 }
 0x48c   :  { %v808_v46 = vadd.f32 %v807_v0, %v806_v44  ;;  %v818_v47 = vadd.f32 %v817_v45, %v816_v43 }
 0x48d   :  { %v830_v50 = vpop.permute.xlu0 %829 }
 0x48e   :  { %877 = vpush %v808_v46  ;;  %v819_v14 = vrot.slane %v818_v47, 1  ;;  %v832_v52 = vsel %vm826_vm15, %v830_v50, 0.0 }
 0x48f   :  { %v835_v57 = vadd.f32 %v834_v55, %v832_v52 }
 0x490   :  { %v820_v49 = vadd.f32 %v819_v14, %v818_v47 }
 0x491   :  { %v838_v3 = vadd.f32 %v837_v59, %v835_v57 }
 0x492   :  { %879 = vpush %v820_v49 }
 0x4bf   :  { %s878_s9 = spop %877 }
 0x4c0   :  { %v810_v53 = vstv %s878_s9 }
 0x4c1   :  { %v823_v56 = vmul.f32 0.125, %v810_v53 }
 0x4c3   :  { %s880_s10 = spop %879  ;;  %v840_v60 = vsel %vm839_vm2, %v823_v56, 0.0 }
 0x4c4   :  { %v822_v58 = vstv %s880_s10  ;;  %v841_v63 = vadd.f32 %v840_v60, %v838_v3 }
 0x4c5   :  { %v824_v61 = vsub.f32 %v822_v58, %v810_v53 }
 0x4c7   :  { %v825_v4 = vmul.f32 0.017857144, %v824_v61 }
 0x4c9   :  { %v843_v5 = vsel %vm842_vm3, %v825_v4, 0.0 }
 0x4ca   :  { %v844_v7 = vadd.f32 %v843_v5, %v841_v63 }
 0x4cc   :  { %845 = vst [vmem:[#allocation13] sm:$0x1] %v844_v7 }
 0x4cd   :  { %1000 = shalt.err (!%p997_p10)
}
 0x4ce   :  { %855 = dma.vmem_to_hbm [thread:$0]  %s853_s12, 16, %s1310_s4, [#allocation7]  }
 0x4cf   :  { %1015 = dma.done.wait [#allocation7], 16  }
 0x4d0   :  { %1016 = vsyncadd [#allocation7], 4294967280 }
 0x4d1   :  { %859 = vsyncpa [#allocation6], 1 }
 0x4d2   :  { %860 = vsyncpa [#allocation9], 1 }
 0x4d3   :  { %861 = vsyncpa [#allocation12], 1 }
 0x4d4   :  { %862 = vsyncpa [#allocation7], 1 }

</bundles_post_ra>
